<compile_context>
chip_gen: v6e
topology: v6e:2x2x1
jax: 0.10.0
libtpu: 0.0.40
codegen_flags: <defaults>
</compile_context>

<pallas_src>
import functools

import jax
import jax.numpy as jnp
from jax.experimental import pallas as pl
from jax.experimental.pallas import tpu as pltpu


def _round_up(x, m):
    return (x + m - 1) // m * m


# ---------------------------------------------------------------------------
# Kernels
# ---------------------------------------------------------------------------
def classify_kernel(x_ref, wd_ref, bd_ref, wc_ref, bc_ref, o_ref):
    """Single-shot head: whole contraction dim H resident in VMEM."""
    # x_ref:  [blk_b, H]   CLS activations (S dim pre-sliced or squeezed away)
    # wd_ref: [H, Hp]      dense weight, pre-transposed (in, out), zero-padded
    # bd_ref: [1, Hp]      dense bias, f32, zero-padded
    # wc_ref: [Hp, Cp]     classify weight, pre-transposed, zero-padded
    # bc_ref: [1, Cp]      classify bias, f32, padded
    # o_ref:  [blk_b, Cp]  padded logits, f32
    x = x_ref[...].astype(wd_ref.dtype)                  # cast operands for MXU
    pooled = jnp.dot(x, wd_ref[...], preferred_element_type=jnp.float32)
    pooled = jnp.tanh(pooled + bd_ref[...])              # f32 VPU/EUP (v5e-safe)
    logits = jnp.dot(pooled.astype(wc_ref.dtype), wc_ref[...],
                     preferred_element_type=jnp.float32) + bc_ref[...]
    o_ref[...] = logits.astype(o_ref.dtype)


def classify_kernel_ktiled(x_ref, wd_ref, bd_ref, wc_ref, bc_ref, o_ref, acc_ref):
    """K-tiled head for large H: f32 accumulator, finalize on last K step."""
    k = pl.program_id(1)

    @pl.when(k == 0)
    def _init():
        acc_ref[...] = jnp.zeros_like(acc_ref)

    x = x_ref[...].astype(wd_ref.dtype)
    acc_ref[...] += jnp.dot(x, wd_ref[...], preferred_element_type=jnp.float32)

    @pl.when(k == pl.num_programs(1) - 1)
    def _finalize():
        pooled = jnp.tanh(acc_ref[...] + bd_ref[...])
        logits = jnp.dot(pooled.astype(wc_ref.dtype), wc_ref[...],
                         preferred_element_type=jnp.float32) + bc_ref[...]
        o_ref[...] = logits.astype(o_ref.dtype)


# ---------------------------------------------------------------------------
# One-time weight preparation (call at init, outside the jitted hot path)
# ---------------------------------------------------------------------------
def prepare_classify_params(w_dense, b_dense, w_cls, b_cls,
                            matmul_dtype=jnp.bfloat16, logit_pad_value=0.0):
    """Transpose PyTorch [out, in] weights to [in, out], zero-pad the output /
    contraction dims to multiples of 128 (lane-dense MXU feeds and unmasked
    stores), and cast matmul operands (bf16 by default; accumulation stays f32
    in-kernel).  `logit_pad_value` (e.g. -1e9) makes the padded logit columns
    inert if the padded [B, Cp] buffer is consumed directly (return_padded)."""
    H = w_dense.shape[0]
    C = w_cls.shape[0]
    Hp = _round_up(H, 128)
    Cp = _round_up(C, 128)
    dt = jnp.dtype(matmul_dtype)
    wd_t = jnp.zeros((H, Hp), dt).at[:, :H].set(jnp.transpose(w_dense).astype(dt))
    bd_p = jnp.zeros((1, Hp), jnp.float32).at[0, :H].set(b_dense.astype(jnp.float32))
    wc_t = jnp.zeros((Hp, Cp), dt).at[:H, :C].set(jnp.transpose(w_cls).astype(dt))
    bc_p = jnp.full((1, Cp), logit_pad_value, jnp.float32).at[0, :C].set(
        b_cls.astype(jnp.float32))
    return {"wd_t": wd_t, "bd": bd_p, "wc_t": wc_t, "bc": bc_p, "num_classes": C}


# ---------------------------------------------------------------------------
# Forward wrapper
# ---------------------------------------------------------------------------
def classify_forward(hidden_states, params, *, block_b=256, block_k=None,
                     k_tile_threshold_bytes=24 << 20, cls_preslice_bytes=1024,
                     return_padded=False):
    """hidden_states: [B, S, H]; returns logits [B, C] (f32), or the padded
    lane-dense [B, Cp] buffer when return_padded=True."""
    B, S, H = hidden_states.shape
    wd_t, bd, wc_t, bc = params["wd_t"], params["bd"], params["wc_t"], params["bc"]
    C = params["num_classes"]
    Hp = wd_t.shape[1]
    Cp = wc_t.shape[1]
    assert wd_t.shape[0] == H, "params were prepared for a different hidden size"

    act_is = jnp.dtype(hidden_states.dtype).itemsize
    w_is = jnp.dtype(wd_t.dtype).itemsize

    # ---- batch tiling: >=2 steps when possible (v7x megacore + pipelining),
    #      capped at block_b, rows aligned to 16 for packed (bf16) operands.
    sub = 16 if min(act_is, w_is) < 4 else 8
    blk_b = min(block_b, B)
    if B >= 2 * sub:
        blk_b = min(blk_b, _round_up(pl.cdiv(B, 2), sub))
    nb = pl.cdiv(B, blk_b)

    # ---- K tiling over the contraction dim for large H (keeps the dense
    #      weight within VMEM without un-fusing the head).
    if block_k is None:
        tk = H
        if H * Hp * w_is > k_tile_threshold_bytes and H % 128 == 0:
            for cand in (1024, 512, 256, 128):
                if cand < H and H % cand == 0:
                    tk = cand
                    break
    else:
        assert block_k == H or (H % block_k == 0 and block_k % 128 == 0)
        tk = block_k
    nk = H // tk

    # ---- CLS gather: rows narrower than ~1 KiB are pre-sliced contiguously
    #      by XLA; otherwise the kernel DMAs only the CLS rows out of [B,S,H].
    preslice = H * act_is < cls_preslice_bytes
    x_in = hidden_states[:, 0, :] if preslice else hidden_states

    # Weights/biases with constant index_maps are fetched once -> single-buffer.
    resident = functools.partial(pl.BlockSpec, pipeline_mode=pl.Buffered(1))

    if nk == 1:
        grid = (nb,)
        if preslice:
            x_spec = pl.BlockSpec((blk_b, H), lambda i: (i, 0))
        else:
            x_spec = pl.BlockSpec((blk_b, None, H), lambda i: (i, 0, 0))
        wd_spec = resident((H, Hp), lambda i: (0, 0))
        bd_spec = resident((1, Hp), lambda i: (0, 0))
        wc_spec = resident((Hp, Cp), lambda i: (0, 0))
        bc_spec = resident((1, Cp), lambda i: (0, 0))
        out_spec = pl.BlockSpec((blk_b, Cp), lambda i: (i, 0))
        scratch = []
        kernel = classify_kernel
        dims = ("parallel",)
    else:
        grid = (nb, nk)
        if preslice:
            x_spec = pl.BlockSpec((blk_b, tk), lambda i, k: (i, k))
        else:
            x_spec = pl.BlockSpec((blk_b, None, tk), lambda i, k: (i, 0, k))
        # Dense weight changes every K step -> keep default double buffering.
        wd_spec = pl.BlockSpec((tk, Hp), lambda i, k: (k, 0))
        bd_spec = resident((1, Hp), lambda i, k: (0, 0))
        wc_spec = resident((Hp, Cp), lambda i, k: (0, 0))
        bc_spec = resident((1, Cp), lambda i, k: (0, 0))
        out_spec = pl.BlockSpec((blk_b, Cp), lambda i, k: (i, 0))
        scratch = [pltpu.VMEM((blk_b, Hp), jnp.float32)]
        kernel = classify_kernel_ktiled
        dims = ("parallel", "arbitrary")

    # ---- VMEM budget: raise the scoped limit only when we actually need it.
    vmem_need = (
        (2 if nk > 1 else 1) * tk * Hp * w_is        # dense weight tile(s)
        + Hp * Cp * w_is + 4 * (Hp + Cp)             # classify weight + biases
        + 2 * blk_b * tk * act_is                    # CLS blocks (double-buffered)
        + 2 * blk_b * Cp * 4                         # f32 output blocks
        + (blk_b * Hp * 4 if nk > 1 else 0)          # f32 accumulator scratch
    )
    vmem_limit = None
    if vmem_need + vmem_need // 2 > (32 << 20):
        vmem_limit = int(min(vmem_need + vmem_need // 2 + (4 << 20), 100 << 20))

    cost = pl.CostEstimate(
        flops=2 * B * H * Hp + 2 * B * Hp * Cp,
        transcendentals=B * Hp,
        bytes_accessed=(B * H * act_is + (H * Hp + Hp * Cp) * w_is
                        + 4 * (Hp + Cp) + B * Cp * 4),
    )

    out_padded = pl.pallas_call(
        kernel,
        out_shape=jax.ShapeDtypeStruct((B, Cp), jnp.float32),   # f32 logits
        grid=grid,
        in_specs=[x_spec, wd_spec, bd_spec, wc_spec, bc_spec],
        out_specs=out_spec,
        scratch_shapes=scratch,
        compiler_params=pltpu.CompilerParams(
            dimension_semantics=dims, vmem_limit_bytes=vmem_limit),
        cost_estimate=cost,
    )(x_in, wd_t, bd, wc_t, bc)

    if return_padded:
        return out_padded
    return out_padded[:, :C]


if __name__ == "__main__":
    keys = jax.random.split(jax.random.PRNGKey(0), 10)

    # --- Test 1: f32 parity at tiny shapes (pre-sliced CLS path, nb=nk=1) ---
    B, S, H, C = 8, 8, 32, 16
    hidden_states = jax.random.normal(keys[0], (B, S, H), dtype=jnp.float32)
    w_dense = jax.random.normal(keys[1], (H, H), dtype=jnp.float32) * 0.05
    b_dense = jax.random.normal(keys[2], (H,), dtype=jnp.float32) * 0.05
    w_cls = jax.random.normal(keys[3], (C, H), dtype=jnp.float32) * 0.05
    b_cls = jax.random.normal(keys[4], (C,), dtype=jnp.float32) * 0.05

    x0 = hidden_states[:, 0, :]
    ref = jnp.tanh(x0 @ w_dense.T + b_dense) @ w_cls.T + b_cls

    params_f32 = prepare_classify_params(w_dense, b_dense, w_cls, b_cls,
                                         matmul_dtype=jnp.float32)
    fwd_f32 = jax.jit(lambda h: classify_forward(h, params_f32))
    out = jax.block_until_ready(fwd_f32(hidden_states))
    assert out.shape == (B, C)
    assert out.dtype == jnp.float32
    assert jnp.allclose(out, ref, atol=1e-5, rtol=1e-5)

    # --- Test 2: production config (default bf16 weights), in-kernel CLS
    #     gather (3-D squeezed BlockSpec), 2 batch blocks and 2 K tiles. ------
    B2, S2, H2, C2 = 32, 8, 256, 10
    hidden2 = jax.random.normal(keys[5], (B2, S2, H2), dtype=jnp.float32)
    w_dense2 = jax.random.normal(keys[6], (H2, H2), dtype=jnp.float32) * 0.05
    b_dense2 = jax.random.normal(keys[7], (H2,), dtype=jnp.float32) * 0.05
    w_cls2 = jax.random.normal(keys[8], (C2, H2), dtype=jnp.float32) * 0.05
    b_cls2 = jax.random.normal(keys[9], (C2,), dtype=jnp.float32) * 0.05

    x02 = hidden2[:, 0, :]
    ref2 = jnp.tanh(x02 @ w_dense2.T + b_dense2) @ w_cls2.T + b_cls2

    params_bf16 = prepare_classify_params(w_dense2, b_dense2, w_cls2, b_cls2)
    fwd_bf16 = jax.jit(lambda h: classify_forward(h, params_bf16, block_k=128))
    out2 = jax.block_until_ready(fwd_bf16(hidden2))
    assert out2.shape == (B2, C2)
    assert out2.dtype == jnp.float32
    assert jnp.allclose(out2, ref2, atol=5e-2, rtol=5e-2)

    print("KERNEL_OK")
</pallas_src>

<mosaic_0001>
module attributes {stable_mosaic.version = 11 : i64} {
  func.func @classify_kernel(%arg0: i32, %arg1: memref<8x32xf32, #tpu.memory_space<vmem>>, %arg2: memref<32x128xf32, #tpu.memory_space<vmem>>, %arg3: memref<1x128xf32, #tpu.memory_space<vmem>>, %arg4: memref<128x128xf32, #tpu.memory_space<vmem>>, %arg5: memref<1x128xf32, #tpu.memory_space<vmem>>, %arg6: memref<8x128xf32, #tpu.memory_space<vmem>>) attributes {dimension_semantics = [#tpu.dimension_semantics<parallel>], iteration_bounds = array<i64: 1>, scalar_prefetch = 0 : i64, scratch_operands = 0 : i64, tpu.core_type = #tpu.core_type<tc>, window_params = [{transform_indices = @transform_0, window_bounds = array<i64: 8, 32>}, {pipeline_mode = #tpu.pipeline_mode<synchronous>, transform_indices = @transform_1, window_bounds = array<i64: 32, 128>}, {pipeline_mode = #tpu.pipeline_mode<synchronous>, transform_indices = @transform_2, window_bounds = array<i64: 1, 128>}, {pipeline_mode = #tpu.pipeline_mode<synchronous>, transform_indices = @transform_3, window_bounds = array<i64: 128, 128>}, {pipeline_mode = #tpu.pipeline_mode<synchronous>, transform_indices = @transform_4, window_bounds = array<i64: 1, 128>}, {transform_indices = @transform_5, window_bounds = array<i64: 8, 128>}]} {
    %c0 = arith.constant 0 : index
    %c0_0 = arith.constant 0 : index
    %0 = vector.load %arg1[%c0, %c0_0] : memref<8x32xf32, #tpu.memory_space<vmem>>, vector<8x32xf32>
    %c0_1 = arith.constant 0 : index
    %c0_2 = arith.constant 0 : index
    %1 = vector.load %arg2[%c0_1, %c0_2] : memref<32x128xf32, #tpu.memory_space<vmem>>, vector<32x128xf32>
    %cst = arith.constant dense<0.000000e+00> : vector<8x128xf32>
    %2 = tpu.matmul %0, %1, %cst {dimension_numbers = #tpu.dot_dimension_numbers<[1], [0], [0], [1], [0, 0, 1, 1], [], []>} : vector<8x32xf32>, vector<32x128xf32>, vector<8x128xf32> -> vector<8x128xf32>
    %c0_3 = arith.constant 0 : index
    %c0_4 = arith.constant 0 : index
    %3 = vector.load %arg3[%c0_3, %c0_4] : memref<1x128xf32, #tpu.memory_space<vmem>>, vector<1x128xf32>
    %4 = vector.broadcast %3 : vector<1x128xf32> to vector<8x128xf32>
    %5 = arith.addf %2, %4 : vector<8x128xf32>
    %6 = math.tanh %5 : vector<8x128xf32>
    %c0_5 = arith.constant 0 : index
    %c0_6 = arith.constant 0 : index
    %7 = vector.load %arg4[%c0_5, %c0_6] : memref<128x128xf32, #tpu.memory_space<vmem>>, vector<128x128xf32>
    %cst_7 = arith.constant dense<0.000000e+00> : vector<8x128xf32>
    %8 = tpu.matmul %6, %7, %cst_7 {dimension_numbers = #tpu.dot_dimension_numbers<[1], [0], [0], [1], [0, 0, 1, 1], [], []>} : vector<8x128xf32>, vector<128x128xf32>, vector<8x128xf32> -> vector<8x128xf32>
    %c0_8 = arith.constant 0 : index
    %c0_9 = arith.constant 0 : index
    %9 = vector.load %arg5[%c0_8, %c0_9] : memref<1x128xf32, #tpu.memory_space<vmem>>, vector<1x128xf32>
    %10 = vector.broadcast %9 : vector<1x128xf32> to vector<8x128xf32>
    %11 = arith.addf %8, %10 : vector<8x128xf32>
    %c0_10 = arith.constant 0 : index
    %c0_11 = arith.constant 0 : index
    %12 = vector.load %arg6[%c0_10, %c0_11] : memref<8x128xf32, #tpu.memory_space<vmem>>, vector<8x128xf32>
    tpu.vector_store %arg6[%c0_10, %c0_11], %11 {strides = array<i32>} : memref<8x128xf32, #tpu.memory_space<vmem>>, vector<8x128xf32>,
    return
  }
  func.func @transform_0(%arg0: i32) -> (i32, i32) {
    %c0_i32 = arith.constant 0 : i32
    %c0_i32_0 = arith.constant 0 : i32
    return %arg0, %c0_i32 : i32, i32
  }
  func.func @transform_1(%arg0: i32) -> (i32, i32) {
    %c0_i32 = arith.constant 0 : i32
    %c0_i32_0 = arith.constant 0 : i32
    %c0_i32_1 = arith.constant 0 : i32
    return %c0_i32, %c0_i32_0 : i32, i32
  }
  func.func @transform_2(%arg0: i32) -> (i32, i32) {
    %c0_i32 = arith.constant 0 : i32
    %c0_i32_0 = arith.constant 0 : i32
    %c0_i32_1 = arith.constant 0 : i32
    return %c0_i32, %c0_i32_0 : i32, i32
  }
  func.func @transform_3(%arg0: i32) -> (i32, i32) {
    %c0_i32 = arith.constant 0 : i32
    %c0_i32_0 = arith.constant 0 : i32
    %c0_i32_1 = arith.constant 0 : i32
    return %c0_i32, %c0_i32_0 : i32, i32
  }
  func.func @transform_4(%arg0: i32) -> (i32, i32) {
    %c0_i32 = arith.constant 0 : i32
    %c0_i32_0 = arith.constant 0 : i32
    %c0_i32_1 = arith.constant 0 : i32
    return %c0_i32, %c0_i32_0 : i32, i32
  }
  func.func @transform_5(%arg0: i32) -> (i32, i32) {
    %c0_i32 = arith.constant 0 : i32
    %c0_i32_0 = arith.constant 0 : i32
    return %arg0, %c0_i32 : i32, i32
  }
}

</mosaic_0001>

<bundles_post_ra>
// kernel: _lambda_.1
= control target key start
LH: loop header
LB: loop body
LE: loop exit
PB: predicated region body
PF: predicated region fallthrough
CT: control target
= control target key end

     0   :  { %10 = vsyncpa [#allocation3], 0  ;;  %s469_s0 = inlined_call_operand.vmem [shape: f32[8,32], index: 0, kind: input, shape index: {}]   ;;  %s470_s1 = inlined_call_operand.hbm [shape: f32[32,128], index: 1, kind: input, shape index: {}]   ;;  %s471_s2 = inlined_call_operand.vmem [shape: f32[1,128], index: 2, kind: input, shape index: {}]   ;;  %s472_s3 = inlined_call_operand.hbm [shape: f32[128,128], index: 3, kind: input, shape index: {}]   ;;  %s473_s4 = inlined_call_operand.vmem [shape: f32[1,128], index: 4, kind: input, shape index: {}]   ;;  %s474_s5 = inlined_call_operand.hbm [shape: f32[8,128], index: 5, kind: output, shape index: {}]  }
   0x1   :  { %11 = vsyncpa [#allocation6], 0 }
   0x2   :  { %12 = vsyncpa [#allocation4], 0  ;;  %s392_s18 = smov [#allocation2]  }
   0x3   :  { %s20_s19 = sshll.u32 %s392_s18, 4  ;;  %s21_s19 = int_to_ptr.vmem [resolvable:$true] %s20_s19 }
   0x4   :  { %s334_s20 = scalar_lea.vmem %s21_s19, 512  ;;  %p339_p1 = scmp.lt.s32.totalorder %s21_s19, %s21_s19 }
   0x5   :  { %p335_p0 = scmp.ne.s32.totalorder %s21_s19, %s334_s20  ;;  %p340_p2 = scmp.lt.s32.totalorder %s334_s20, %s334_s20 }
   0x7   :  { %p341_p3 = por %p340_p2, %p339_p1 }
   0x9   :  { %p342_p4 = pnand %p341_p3, %p335_p0 }
   0xb   :  { %345 = shalt.err (!%p342_p4)
}
   0xc   :  { %s393_s21 = smov 128   ;;  %s394_s22 = smov 8  }
   0xd   :  { %26 = dma.hbm_to_vmem [thread:$0]  %s470_s1, 512, %s21_s19, [#allocation3], %s393_s21, %s393_s21, %s394_s22  }
   0xe   :  { %s395_s25 = smov [#allocation5]  }
   0xf   :  { %s34_s26 = sshll.u32 %s395_s25, 4  ;;  %s35_s26 = int_to_ptr.vmem [resolvable:$true] %s34_s26 }
  0x10   :  { %s354_s27 = scalar_lea.vmem %s35_s26, 2048  ;;  %p359_p6 = scmp.lt.s32.totalorder %s35_s26, %s35_s26 }
  0x11   :  { %p355_p5 = scmp.ne.s32.totalorder %s35_s26, %s354_s27  ;;  %p360_p7 = scmp.lt.s32.totalorder %s354_s27, %s354_s27 }
  0x13   :  { %p361_p8 = por %p360_p7, %p359_p6 }
  0x15   :  { %p362_p9 = pnand %p361_p8, %p355_p5 }
  0x17   :  { %365 = shalt.err (!%p362_p9)
}
  0x18   :  { %40 = dma.hbm_to_vmem [thread:$0]  %s472_s3, 2048, %s35_s26, [#allocation6], %s393_s21, %s393_s21, %s394_s22  }
  0x19   :  { %386 = dma.done.wait [#allocation3], 512  }
  0x1a   :  { %387 = vsyncadd [#allocation3], 4294966784 }
  0x1b   :  { %388 = dma.done.wait [#allocation6], 2048  }
  0x1c   :  { %389 = vsyncadd [#allocation6], 4294965248  ;;  %v396_v0 = vmov 0.0   ;;  %vm397_vm0 = vmmov 0   ;;  %v53_v1 = vld [vmem:[#allocation2 + $0x18] sm:$0xff]  ;;  %v52_v2 = vld [vmem:[#allocation2 + $0x10] sm:$0xff] }
  0x1d   :  { %271 = vmatprep.subr.mxu0 %v396_v0  ;;  %279 = vmatprep.mubr.msk.f32.mxu0 %vm397_vm0, %v396_v0  ;;  %v151_v3 = vld [vmem:[#allocation5 + $0x78] sm:$0xff]  ;;  %v51_v4 = vld [vmem:[#allocation2 + $0x8] sm:$0xff]  ;;  %v150_v5 = vld [vmem:[#allocation5 + $0x70] sm:$0xff]  ;;  %vm61_vm1 = vcmask 261120   ;;  %s398_s8 = smov [#allocation7]  }
  0x1e   :  { %282 = vmatprep.subr.mxu1 %v396_v0  ;;  %314 = vmatprep.mubr.msk.f32.mxu1 %vm397_vm0, %v396_v0  ;;  %v149_v6 = vld [vmem:[#allocation5 + $0x68] sm:$0xff]  ;;  %v50_v7 = vld [vmem:[#allocation2] sm:$0xff]  ;;  %v147_v10 = vld [vmem:[#allocation5 + $0x58] sm:$0xff]  ;;  %s236_s9 = sshll.u32 %s398_s8, 4  ;;  %s237_s9 = int_to_ptr.vmem [resolvable:$true] %s236_s9 }
  0x1f   :  { %272 = vmatpush3.msra.mxu0 %v53_v1  ;;  %283 = vmatpush3.msra.mxu1 %v151_v3  ;;  %v49_v8 = vld [vmem:[%s469_s0] sm:$0xff]  ;;  %v146_v11 = vld [vmem:[#allocation5 + $0x50] sm:$0xff]  ;;  %v145_v12 = vld [vmem:[#allocation5 + $0x48] sm:$0xff]  ;;  %s366_s10 = scalar_lea.vmem %s237_s9, 128  ;;  %p371_p11 = scmp.lt.s32.totalorder %s237_s9, %s237_s9 }
  0x20   :  { %273 = vmatprep.subr.mxu0 %v396_v0  ;;  %284 = vmatprep.subr.mxu1 %v396_v0  ;;  %v148_v9 = vld [vmem:[#allocation5 + $0x60] sm:$0xff]  ;;  %v143_v14 = vld [vmem:[#allocation5 + $0x38] sm:$0xff]  ;;  %v142_v15 = vld [vmem:[#allocation5 + $0x30] sm:$0xff]  ;;  %p367_p10 = scmp.ne.s32.totalorder %s237_s9, %s366_s10  ;;  %p372_p12 = scmp.lt.s32.totalorder %s366_s10, %s366_s10 }
  0x21   :  { %274 = vmatpush3.msra.mxu0 %v52_v2  ;;  %285 = vmatpush3.msra.mxu1 %v150_v5  ;;  %v144_v13 = vld [vmem:[#allocation5 + $0x40] sm:$0xff]  ;;  %v141_v16 = vld [vmem:[#allocation5 + $0x28] sm:$0xff]  ;;  %v139_v18 = vld [vmem:[#allocation5 + $0x18] sm:$0xff] }
  0x22   :  { %275 = vmatprep.subr.mxu0 %v396_v0  ;;  %286 = vmatprep.subr.mxu1 %v396_v0  ;;  %v140_v17 = vld [vmem:[#allocation5 + $0x20] sm:$0xff]  ;;  %v138_v19 = vld [vmem:[#allocation5 + $0x10] sm:$0xff]  ;;  %v137_v20 = vld [vmem:[#allocation5 + $0x8] sm:$0xff]  ;;  %p373_p13 = por %p372_p12, %p371_p11 }
  0x23   :  { %276 = vmatpush3.msra.mxu0 %v51_v4  ;;  %287 = vmatpush3.msra.mxu1 %v149_v6  ;;  %v136_v21 = vld [vmem:[#allocation5] sm:$0xff] }
  0x24   :  { %277 = vmatprep.subr.mxu0 %v396_v0  ;;  %288 = vmatprep.subr.mxu1 %v396_v0  ;;  %v246_v22 = vld [vmem:[%s471_s2] ss:$0 sm:$0xff]  ;;  %p374_p0 = pnand %p373_p13, %p367_p10 }
  0x25   :  { %278 = vmatpush3.msra.mxu0 %v50_v7  ;;  %289 = vmatpush3.msra.mxu1 %v148_v9  ;;  %v248_v27 = vld [vmem:[%s473_s4] ss:$0 sm:$0xff] }
  0x26   :  { %280 = vmatmul.mubr.msk.f32.vlgmr.msra.gmra.mxu0 %vm61_vm1, %v49_v8  ;;  %290 = vmatprep.subr.mxu1 %v396_v0 }
  0x27   :  { %291 = vmatpush3.msra.mxu1 %v147_v10 }
  0x28   :  { %292 = vmatprep.subr.mxu1 %v396_v0 }
  0x29   :  { %293 = vmatpush3.msra.mxu1 %v146_v11 }
  0x2a   :  { %294 = vmatprep.subr.mxu1 %v396_v0 }
  0x2b   :  { %295 = vmatpush3.msra.mxu1 %v145_v12 }
  0x2c   :  { %296 = vmatprep.subr.mxu1 %v396_v0 }
  0x2d   :  { %297 = vmatpush3.msra.mxu1 %v144_v13 }
  0x2e   :  { %298 = vmatprep.subr.mxu1 %v396_v0 }
  0x2f   :  { %299 = vmatpush3.msra.mxu1 %v143_v14 }
  0x30   :  { %300 = vmatprep.subr.mxu1 %v396_v0 }
  0x31   :  { %301 = vmatpush3.msra.mxu1 %v142_v15 }
  0x32   :  { %302 = vmatprep.subr.mxu1 %v396_v0 }
  0x33   :  { %303 = vmatpush3.msra.mxu1 %v141_v16 }
  0x34   :  { %304 = vmatprep.subr.mxu1 %v396_v0 }
  0x35   :  { %305 = vmatpush3.msra.mxu1 %v140_v17 }
  0x36   :  { %306 = vmatprep.subr.mxu1 %v396_v0 }
  0x37   :  { %307 = vmatpush3.msra.mxu1 %v139_v18 }
  0x38   :  { %308 = vmatprep.subr.mxu1 %v396_v0 }
  0x39   :  { %309 = vmatpush3.msra.mxu1 %v138_v19 }
  0x3a   :  { %310 = vmatprep.subr.mxu1 %v396_v0 }
  0x3b   :  { %311 = vmatpush3.msra.mxu1 %v137_v20 }
  0x3c   :  { %312 = vmatprep.subr.mxu1 %v396_v0 }
  0x3d   :  { %313 = vmatpush3.msra.mxu1 %v136_v21 }
  0xe6   :  { %v131_v23 = vpop.f32.mrf.mxu0 }
  0xe7   :  { %v132_v24 = vadd.f32 %v246_v22, %v131_v23 }
  0xe8   :  { %v281_v25 = vpop.f32.mrf.mxu0 }
  0xe9   :  { %324 = vtanh.f32 %v132_v24 }
  0xf6   :  { %v325_v26 = vpop.eup %324 }
  0xf7   :  { %315 = vmatmul.mubr.f32.vlgmr.msra.gmra.mxu1 %v325_v26 }
 0x1b7   :  { %v225_v28 = vpop.f32.mrf.mxu1 }
 0x1b8   :  { %v226_v29 = vadd.f32 %v248_v27, %v225_v28 }
 0x1b9   :  { %v316_v30 = vpop.f32.mrf.mxu1 }
 0x1ba   :  { %229 = vst [vmem:[#allocation7] sm:$0xff] %v226_v29 }
 0x1bb   :  { %377 = shalt.err (!%p374_p0)
}
 0x1bc   :  { %239 = dma.vmem_to_hbm [thread:$0]  %s237_s9, 128, %s474_s5, [#allocation4]  }
 0x1bd   :  { %390 = dma.done.wait [#allocation4], 128  }
 0x1be   :  { %391 = vsyncadd [#allocation4], 4294967168 }
 0x1bf   :  { %243 = vsyncpa [#allocation3], 1 }
 0x1c0   :  { %244 = vsyncpa [#allocation6], 1 }
 0x1c1   :  { %245 = vsyncpa [#allocation4], 1 }

</bundles_post_ra>
